<compile_context>
chip_gen: v7x
topology: tpu7x:2x2x1
jax: 0.10.0
libtpu: 0.0.40
codegen_flags: <defaults>
</compile_context>

<pallas_src>
import functools

import jax
import jax.numpy as jnp
from jax.experimental import pallas as pl
from jax.experimental.pallas import tpu as pltpu


def _round_up(x, m):
    return ((x + m - 1) // m) * m


def _mlp_readout_kernel(x_ref, w_ref, b_ref, o_ref, *, apply_sigmoid, tiny_n):
    # x_ref: (block_m, in_dim)              VMEM
    # w_ref: (1, in_dim)  if tiny_n else (in_dim, out_dim)   VMEM (resident)
    # b_ref: (1, out_dim)                   VMEM (resident)
    # o_ref: (block_m, out_dim)             VMEM (real width, no lane padding)
    x = x_ref[...]

    if tiny_n:
        # out_dim == 1: matvec on VPU (multiply) + XLU (lane reduce); MXU idle.
        acc = jnp.sum(
            x.astype(jnp.float32) * w_ref[...].astype(jnp.float32),
            axis=-1, keepdims=True)                              # (block_m, 1)
        acc = acc + b_ref[...].astype(jnp.float32)
    else:
        # General path: weight already transposed to (in_dim, out_dim) in the
        # wrapper -> plain MXU matmul, no per-step transpose in the kernel.
        acc = jnp.dot(x, w_ref[...], preferred_element_type=jnp.float32)
        acc = acc + b_ref[...].astype(jnp.float32)

    if apply_sigmoid:
        # Applied only to the narrow real output (block_m, out_dim).
        acc = jax.nn.sigmoid(acc)
    o_ref[...] = acc.astype(o_ref.dtype)


def _pick_block_m(B, in_dim, out_dim, itemsize, sublane):
    # Big row tiles amortize the ~0.35us per-grid-step overhead; the VMEM
    # budget keeps double-buffered x/out tiles plus the resident weight/bias
    # well under the smallest default scoped-VMEM limit across generations
    # (v7x scoped default is 32 MiB, physical 64 MiB).
    cap = 2048 if in_dim <= 512 else 512
    bm = min(_round_up(B, sublane), cap)
    budget = 12 * 1024 * 1024
    fixed = (out_dim * in_dim + out_dim) * itemsize * 2   # weight + bias buffers
    per_row = (in_dim + out_dim) * itemsize * 2           # x row + out row (2x buffered)
    while bm > sublane and fixed + bm * per_row > budget:
        bm //= 2
    bm = max(sublane, (bm // sublane) * sublane)
    # v7x has 2 TensorCores: make sure the "parallel" grid axis has >= 2 blocks
    # whenever the batch allows it, so one core is not left idle.
    if pl.cdiv(B, bm) < 2 and B >= 2 * sublane:
        bm = max(sublane, _round_up(pl.cdiv(B, 2), sublane))
    return bm


def mlp_readout(x, weight, bias, out_act="sigmoid", *, block_m=None,
                min_pallas_batch=256):
    """x: [B, in_dim]; weight: [out_dim, in_dim] (PyTorch layout); bias: [out_dim]."""
    B, in_dim = x.shape
    out_dim, in_dim_w = weight.shape
    assert in_dim_w == in_dim
    apply_sigmoid = out_act == "sigmoid"

    # Tiny batches: pallas_call fixed cost dwarfs the work; let XLA fuse it.
    if B < min_pallas_batch:
        y = x @ weight.T + bias
        return jax.nn.sigmoid(y) if apply_sigmoid else y

    tiny_n = out_dim == 1
    itemsize = jnp.dtype(x.dtype).itemsize
    sublane = {4: 8, 2: 16, 1: 32}.get(itemsize, 8)

    if block_m is None:
        block_m = _pick_block_m(B, in_dim, out_dim, itemsize, sublane)
    num_blocks = pl.cdiv(B, block_m)

    if tiny_n:
        w_arg = weight                                       # (1, in_dim)
        w_spec = pl.BlockSpec((1, in_dim), lambda i: (0, 0))
    else:
        # One-time transpose of the small weight in the wrapper (outside the
        # grid loop) so the kernel never re-transposes it per step.
        w_arg = weight.T                                     # (in_dim, out_dim)
        w_spec = pl.BlockSpec((in_dim, out_dim), lambda i: (0, 0))
    b_arg = bias.reshape(1, out_dim)

    kernel = functools.partial(
        _mlp_readout_kernel, apply_sigmoid=apply_sigmoid, tiny_n=tiny_n)

    cost = pl.CostEstimate(
        flops=2 * B * in_dim * out_dim + B * out_dim,
        transcendentals=B * out_dim if apply_sigmoid else 0,
        bytes_accessed=(B * in_dim + out_dim * in_dim + out_dim
                        + B * out_dim) * itemsize,
    )

    return pl.pallas_call(
        kernel,
        out_shape=jax.ShapeDtypeStruct((B, out_dim), x.dtype),
        grid_spec=pltpu.PrefetchScalarGridSpec(
            num_scalar_prefetch=0,
            grid=(num_blocks,),
            in_specs=[
                pl.BlockSpec((block_m, in_dim), lambda i: (i, 0)),
                w_spec,
                pl.BlockSpec((1, out_dim), lambda i: (0, 0)),
            ],
            out_specs=pl.BlockSpec((block_m, out_dim), lambda i: (i, 0)),
        ),
        compiler_params=pltpu.CompilerParams(
            dimension_semantics=("parallel",),
        ),
        cost_estimate=cost,
    )(x, w_arg, b_arg)


if __name__ == "__main__":
    key = jax.random.PRNGKey(0)
    ks = jax.random.split(key, 7)

    def ref_fn(x, w, b, act):
        y = x @ w.T + b
        return jax.nn.sigmoid(y) if act == "sigmoid" else y

    in_dim = 32
    bound = 1.0 / (in_dim ** 0.5)

    # ---- 1) Tiny batch (B=8): dispatch threshold -> fused jnp fallback ----
    x_small = jax.random.normal(ks[0], (8, in_dim), dtype=jnp.float32)
    w1 = jax.random.uniform(ks[1], (1, in_dim), minval=-bound, maxval=bound,
                            dtype=jnp.float32)
    b1 = jax.random.uniform(ks[2], (1,), minval=-bound, maxval=bound,
                            dtype=jnp.float32)
    out_small = jax.block_until_ready(mlp_readout(x_small, w1, b1, out_act="sigmoid"))
    assert out_small.shape == (8, 1)
    assert jnp.allclose(out_small, ref_fn(x_small, w1, b1, "sigmoid"),
                        atol=1e-5, rtol=1e-5)

    # ---- 2) Same tiny shapes, forced through the Pallas kernel ----
    out_forced = jax.block_until_ready(
        mlp_readout(x_small, w1, b1, out_act="sigmoid", min_pallas_batch=0))
    assert jnp.allclose(out_forced, ref_fn(x_small, w1, b1, "sigmoid"),
                        atol=1e-5, rtol=1e-5)

    # ---- 3) CTR readout (out_dim=1, sigmoid): Pallas VPU/XLU path, 2 blocks ----
    B = 384
    x = jax.random.normal(ks[3], (B, in_dim), dtype=jnp.float32)
    out_ctr = jax.block_until_ready(mlp_readout(x, w1, b1, out_act="sigmoid"))
    assert out_ctr.shape == (B, 1)
    assert jnp.allclose(out_ctr, ref_fn(x, w1, b1, "sigmoid"), atol=1e-5, rtol=1e-5)

    # ---- 4) Rating readout (out_dim=1, identity) ----
    out_rate = jax.block_until_ready(mlp_readout(x, w1, b1, out_act=None))
    assert jnp.allclose(out_rate, ref_fn(x, w1, b1, None), atol=1e-5, rtol=1e-5)

    # ---- 5) General MXU path with ragged batch (B not a multiple of block_m) ----
    B2, out2 = 200, 4
    x2 = jax.random.normal(ks[4], (B2, in_dim), dtype=jnp.float32)
    w2 = jax.random.uniform(ks[5], (out2, in_dim), minval=-bound, maxval=bound,
                            dtype=jnp.float32)
    b2 = jax.random.uniform(ks[6], (out2,), minval=-bound, maxval=bound,
                            dtype=jnp.float32)
    out_gen = jax.block_until_ready(
        mlp_readout(x2, w2, b2, out_act="sigmoid", min_pallas_batch=0))
    assert out_gen.shape == (B2, out2)
    assert jnp.allclose(out_gen, ref_fn(x2, w2, b2, "sigmoid"), atol=1e-5, rtol=1e-5)

    print("KERNEL_OK")
</pallas_src>

<mosaic_0001>
module attributes {stable_mosaic.version = 11 : i64} {
  func.func @_mlp_readout_kernel(%arg0: i32, %arg1: memref<8x32xf32, #tpu.memory_space<vmem>>, %arg2: memref<1x32xf32, #tpu.memory_space<vmem>>, %arg3: memref<1x1xf32, #tpu.memory_space<vmem>>, %arg4: memref<8x1xf32, #tpu.memory_space<vmem>>) attributes {dimension_semantics = [#tpu.dimension_semantics<parallel>], iteration_bounds = array<i64: 1>, scalar_prefetch = 0 : i64, scratch_operands = 0 : i64, tpu.core_type = #tpu.core_type<tc>, window_params = [{transform_indices = @transform_0, window_bounds = array<i64: 8, 32>}, {pipeline_mode = #tpu.pipeline_mode<synchronous>, transform_indices = @transform_1, window_bounds = array<i64: 1, 32>}, {pipeline_mode = #tpu.pipeline_mode<synchronous>, transform_indices = @transform_2, window_bounds = array<i64: 1, 1>}, {transform_indices = @transform_3, window_bounds = array<i64: 8, 1>}]} {
    %c0 = arith.constant 0 : index
    %c0_0 = arith.constant 0 : index
    %0 = vector.load %arg1[%c0, %c0_0] : memref<8x32xf32, #tpu.memory_space<vmem>>, vector<8x32xf32>
    %c0_1 = arith.constant 0 : index
    %c0_2 = arith.constant 0 : index
    %1 = vector.load %arg2[%c0_1, %c0_2] : memref<1x32xf32, #tpu.memory_space<vmem>>, vector<1x32xf32>
    %2 = vector.broadcast %1 : vector<1x32xf32> to vector<8x32xf32>
    %3 = arith.mulf %0, %2 : vector<8x32xf32>
    %cst = arith.constant dense<0.000000e+00> : vector<8xf32>
    %4 = vector.multi_reduction <add>, %3, %cst [1] : vector<8x32xf32> to vector<8xf32>
    %5 = vector.shape_cast %4 : vector<8xf32> to vector<8x1xf32>
    %c0_3 = arith.constant 0 : index
    %c0_4 = arith.constant 0 : index
    %6 = vector.load %arg3[%c0_3, %c0_4] : memref<1x1xf32, #tpu.memory_space<vmem>>, vector<1x1xf32>
    %7 = vector.broadcast %6 : vector<1x1xf32> to vector<8x1xf32>
    %8 = arith.addf %5, %7 : vector<8x1xf32>
    %9 = arith.negf %8 : vector<8x1xf32>
    %10 = math.exp %9 : vector<8x1xf32>
    %cst_5 = arith.constant 1.000000e+00 : f32
    %11 = vector.broadcast %cst_5 : f32 to vector<8x1xf32>
    %12 = arith.addf %11, %10 : vector<8x1xf32>
    %13 = arith.divf %11, %12 : vector<8x1xf32>
    %c0_6 = arith.constant 0 : index
    %c0_7 = arith.constant 0 : index
    %14 = vector.load %arg4[%c0_6, %c0_7] : memref<8x1xf32, #tpu.memory_space<vmem>>, vector<8x1xf32>
    tpu.vector_store %arg4[%c0_6, %c0_7], %13 {strides = array<i32>} : memref<8x1xf32, #tpu.memory_space<vmem>>, vector<8x1xf32>,
    return
  }
  func.func @transform_0(%arg0: i32) -> (i32, i32) {
    %c0_i32 = arith.constant 0 : i32
    %c0_i32_0 = arith.constant 0 : i32
    return %arg0, %c0_i32 : i32, i32
  }
  func.func @transform_1(%arg0: i32) -> (i32, i32) {
    %c0_i32 = arith.constant 0 : i32
    %c0_i32_0 = arith.constant 0 : i32
    %c0_i32_1 = arith.constant 0 : i32
    return %c0_i32, %c0_i32_0 : i32, i32
  }
  func.func @transform_2(%arg0: i32) -> (i32, i32) {
    %c0_i32 = arith.constant 0 : i32
    %c0_i32_0 = arith.constant 0 : i32
    %c0_i32_1 = arith.constant 0 : i32
    return %c0_i32, %c0_i32_0 : i32, i32
  }
  func.func @transform_3(%arg0: i32) -> (i32, i32) {
    %c0_i32 = arith.constant 0 : i32
    %c0_i32_0 = arith.constant 0 : i32
    return %arg0, %c0_i32 : i32, i32
  }
}

</mosaic_0001>

<bundles_post_ra>
// kernel: tpu_custom_call.1
= control target key start
LH: loop header
LB: loop body
LE: loop exit
PB: predicated region body
PF: predicated region fallthrough
CT: control target
= control target key end

     0   :  { %s136_s0 = inlined_call_operand.hbm [shape: f32[8,32], index: 0, kind: input, shape index: {}]   ;;  %s137_s1 = inlined_call_operand.vmem [shape: f32[1,32], index: 1, kind: input, shape index: {}]   ;;  %s138_s2 = inlined_call_operand.<no memory space> [shape: f32[1,1], index: 2, kind: input, shape index: {}]   ;;  %s139_s3 = inlined_call_operand.vmem [shape: f32[8,1], index: 3, kind: output, shape index: {}]  }
   0x1   :  { %v8_v0 = vstv %s138_s2 }
   0x2   :  { %9 = vst [vmem:[#allocation2] sm:$0x1] %v8_v0 }
   0x3   :  { %10 = vsyncpa [#allocation4], 0  ;;  %s94_s14 = smov [#allocation3]   ;;  %s70_s18 = scalar_lea.hbm %s136_s0, 128 }
   0x4   :  { %s17_s15 = sshll.u32 %s94_s14, 4  ;;  %p71_p0 = scmp.ne.s32.totalorder %s136_s0, %s70_s18  ;;  %s18_s15 = int_to_ptr.vmem [resolvable:$true] %s17_s15 }
   0x5   :  { %p74_p1 = scmp.lt.u32.totalorder %s70_s18, %s136_s0 }
   0x7   :  { %p76_p2 = pnand %p74_p1, %p71_p0 }
   0x9   :  { %79 = shalt.err (!%p76_p2)
}
   0xa   :  { %s80_s2 = scalar_lea.vmem %s18_s15, 128  ;;  %p85_p4 = scmp.lt.s32.totalorder %s18_s15, %s18_s15 }
   0xb   :  { %p81_p3 = scmp.ne.s32.totalorder %s18_s15, %s80_s2  ;;  %p86_p5 = scmp.lt.s32.totalorder %s80_s2, %s80_s2 }
   0xd   :  { %p87_p6 = por %p86_p5, %p85_p4 }
   0xf   :  { %p88_p7 = pnand %p87_p6, %p81_p3 }
  0x11   :  { %91 = shalt.err (!%p88_p7)
}
  0x12   :  { %20 = dma.hbm_to_vmem [thread:$0]  %s136_s0, 128, %s18_s15, [#allocation4]  }
  0x13   :  { %92 = dma.done.wait [#allocation4], 128  }
  0x14   :  { %93 = vsyncadd [#allocation4], 4294967168  ;;  %v28_v1 = vld [vmem:[#allocation3] sm:$0xff]  ;;  %v62_v2 = vld [vmem:[%s137_s1] ss:$0 sm:$0xff]  ;;  %vm37_vm0 = vcmask 261120  }
  0x15   :  { %v36_v3 = vmul.f32 %v62_v2, %v28_v1  ;;  %v63_v5 = vld [vmem:[#allocation2] ss:$0 sm:$0xff]  ;;  %vm55_vm1 = vcmask 7168  }
  0x17   :  { %v38_v4 = vsel %vm37_vm0, %v36_v3, 0.0 }
  0x18   :  { %39 = vadd.xlane.f32.xlu0 %v38_v4 }
  0xa5   :  { %v40_v6 = vpop.xlane.xlu0 %39 }
  0xa6   :  { %v48_v7 = vadd.f32 %v63_v5, %v40_v6 }
  0xa8   :  { %v64_v8 = vmul.f32 -1.442695, %v48_v7 }
  0xaa   :  { %66 = vpow2.f32 %v64_v8 }
  0xb4   :  { %v67_v9 = vpop.eup %66 }
  0xb5   :  { %v52_v10 = vadd.f32 1.0, %v67_v9 }
  0xb7   :  { %68 = vrcp.f32 %v52_v10 }
  0xc1   :  { %v69_v11 = vpop.eup %68 }
  0xc2   :  { %56 = vst.msk [vmem:[%s139_s3] sm:$0xff] %vm55_vm1, %v69_v11 }
  0xc3   :  { %61 = vsyncpa [#allocation4], 1 }

</bundles_post_ra>
